<compile_context>
chip_gen: v7x
topology: tpu7x:2x2x1
jax: 0.10.0
libtpu: 0.0.40
codegen_flags: <defaults>
</compile_context>

<pallas_src>
import functools
import math

import jax
import jax.numpy as jnp
from jax import lax
from jax.experimental import pallas as pl
from jax.experimental.pallas import tpu as pltpu


# severity -> (loc, scale, zoom, threshold, blur_radius, blend)
_MIX = [
    (0.1, 0.3, 3, 0.5, 4, 0.8),
    (0.2, 0.3, 2, 0.5, 4, 0.7),
    (0.55, 0.3, 4, 0.9, 8, 0.7),
    (0.55, 0.3, 4.5, 0.85, 8, 0.65),
    (0.55, 0.3, 2.5, 0.85, 12, 0.55),
]

_LANES = 128
_SUBLANES = 8
_MAX_TILE_LANE_ROWS = 2048        # 2048 * 128 * 4B = 1 MiB per f32 channel buffer
_MIN_GRID_STEPS = 4               # keep the pipeline (and both v7x TCs) busy
_VMEM_LIMIT_BYTES = 32 * 1024 * 1024


def _round_up(v, m):
    return ((v + m - 1) // m) * m


# ----------------------------------------------------------------------------
# Pallas kernel: fused grayscale-whiten blend + snow composite + clamp
# ----------------------------------------------------------------------------
def _snow_compose_kernel(x_ref, snow_ref, o_ref, *, blend):
    """x_ref/o_ref: (3, TR, L) native dtype; snow_ref: (TR, L) f32."""
    r = x_ref[0].astype(jnp.float32)
    g = x_ref[1].astype(jnp.float32)
    b = x_ref[2].astype(jnp.float32)
    # cv2 RGB2GRAY weights, then the *1.5 + 0.5 "whitening" boost.
    gray_boost = (0.299 * r + 0.587 * g + 0.114 * b) * 1.5 + 0.5
    snow_tot = snow_ref[...]
    c = jnp.float32(blend)
    omc = jnp.float32(1.0 - blend)
    for ch, v in enumerate((r, g, b)):  # static unroll over 3 channels
        blended = c * v + omc * jnp.maximum(v, gray_boost)
        o_ref[ch] = jnp.clip(blended + snow_tot, 0.0, 1.0).astype(o_ref.dtype)


def _pick_tile_rows(rows, lanes):
    """Pick a tile height (in sublane-rows) for a (rows, lanes) layout."""
    lane_rows_per_row = max(lanes // _LANES, 1)
    cap = max(_SUBLANES,
              (_MAX_TILE_LANE_ROWS // lane_rows_per_row) // _SUBLANES * _SUBLANES)
    want = _round_up(pl.cdiv(rows, _MIN_GRID_STEPS), _SUBLANES)
    return max(_SUBLANES, min(cap, want))


def _run_compose(x3, snow2, blend, tile_rows, io_dtype):
    """x3: (3, rows, lanes) io_dtype; snow2: (rows, lanes) f32."""
    _, rows, lanes = x3.shape
    grid = (rows // tile_rows,)
    kernel = functools.partial(_snow_compose_kernel, blend=blend)
    io_bytes = jnp.dtype(io_dtype).itemsize
    cost = pl.CostEstimate(
        flops=30 * rows * lanes, transcendentals=0,
        bytes_accessed=(6 * io_bytes + 4) * rows * lanes)
    return pl.pallas_call(
        kernel,
        out_shape=jax.ShapeDtypeStruct((3, rows, lanes), io_dtype),
        grid_spec=pltpu.PrefetchScalarGridSpec(
            num_scalar_prefetch=0,
            grid=grid,
            in_specs=[
                pl.BlockSpec((3, tile_rows, lanes), lambda i: (0, i, 0)),
                pl.BlockSpec((tile_rows, lanes), lambda i: (i, 0)),
            ],
            out_specs=pl.BlockSpec((3, tile_rows, lanes), lambda i: (0, i, 0)),
        ),
        compiler_params=pltpu.CompilerParams(
            dimension_semantics=("parallel",),
            vmem_limit_bytes=_VMEM_LIMIT_BYTES),
        cost_estimate=cost,
    )(x3, snow2)


# ----------------------------------------------------------------------------
# Host/JAX helpers for building the snow layer (small, RNG-driven setup)
# ----------------------------------------------------------------------------
def _interp_matrix(out_n, in_n):
    """Bilinear interpolation matrix with scipy.ndimage.zoom(order=1) coords."""
    out_n = max(out_n, 1)
    in_n = max(in_n, 1)
    if out_n == 1 or in_n == 1:
        return jnp.zeros((out_n, in_n), jnp.float32).at[:, 0].set(1.0)
    c = jnp.arange(out_n, dtype=jnp.float32) * ((in_n - 1) / (out_n - 1))
    i0 = jnp.floor(c).astype(jnp.int32)
    i1 = jnp.minimum(i0 + 1, in_n - 1)
    w = c - i0.astype(jnp.float32)
    cols = jnp.arange(in_n, dtype=jnp.int32)[None, :]
    return ((cols == i0[:, None]).astype(jnp.float32) * (1.0 - w)[:, None]
            + (cols == i1[:, None]).astype(jnp.float32) * w[:, None])


def _clipped_zoom(layer, zoom):
    """clipped_zoom from the spec; bilinear resample as two small matmuls."""
    h = layer.shape[0]
    ch = int(math.ceil(h / zoom))
    top = (h - ch) // 2
    crop = layer[top:top + ch, top:top + ch]
    zh = int(round(ch * zoom))
    m = _interp_matrix(zh, ch)          # (zh, ch), reused for rows & cols
    zoomed = m @ crop @ m.T
    trim = (zh - h) // 2
    return zoomed[trim:trim + h, trim:trim + h]


def _motion_blur_kernel_2d(ksize, angle_deg):
    """Kornia-style motion kernel: middle-row line, rotated (bilinear), normalized.

    `angle_deg` may be a traced device scalar (no host sync)."""
    mid = ksize // 2
    c = (ksize - 1) / 2.0
    theta = jnp.deg2rad(angle_deg)
    cos_t, sin_t = jnp.cos(theta), jnp.sin(theta)
    ys, xs = jnp.meshgrid(jnp.arange(ksize, dtype=jnp.float32),
                          jnp.arange(ksize, dtype=jnp.float32), indexing="ij")
    dx, dy = xs - c, ys - c
    sx = cos_t * dx + sin_t * dy + c     # inverse-rotate output coords
    sy = -sin_t * dx + cos_t * dy + c
    x0 = jnp.floor(sx).astype(jnp.int32)
    y0 = jnp.floor(sy).astype(jnp.int32)
    wx = sx - x0.astype(jnp.float32)
    wy = sy - y0.astype(jnp.float32)

    def tap(yy, xx):
        # Base kernel is a single row of ones at y == mid (closed form, no gather).
        return jnp.where((yy == mid) & (xx >= 0) & (xx < ksize), 1.0, 0.0)

    k = (tap(y0, x0) * (1 - wy) * (1 - wx) + tap(y0, x0 + 1) * (1 - wy) * wx
         + tap(y0 + 1, x0) * wy * (1 - wx) + tap(y0 + 1, x0 + 1) * wy * wx)
    s = jnp.sum(k)
    base = jnp.zeros((ksize, ksize), jnp.float32).at[mid, :].set(1.0)
    return jnp.where(s > 0, k / jnp.maximum(s, 1e-12), base / float(ksize))


def _prepare_snow_layers(height, width, mix, seed):
    """Returns snow_tot = snow_layer + flip_H(snow_layer) as (H, W) float32."""
    key = jax.random.PRNGKey(seed)
    k_norm, k_angle = jax.random.split(key)
    base = mix[0] + mix[1] * jax.random.normal(k_norm, (height, width), jnp.float32)
    layer = _clipped_zoom(base, mix[2])
    layer = jnp.where(layer < mix[3], 0.0, layer)
    layer = jnp.clip(layer, 0.0, 1.0)

    ksize = int(mix[4]) * 2 + 1
    angle = jax.random.uniform(k_angle, (), minval=-135.0, maxval=-45.0)  # stays on device
    kern = _motion_blur_kernel_2d(ksize, angle)
    blurred = lax.conv_general_dilated(
        layer[None, None], kern[None, None],
        window_strides=(1, 1), padding="SAME")[0, 0]

    # Spec quirk: snow_layer is (1, H, W) at the np.rot90(k=2) call, so only the
    # H axis actually gets flipped (axis 0 has size 1).  Pre-sum both copies so
    # the Pallas kernel reads a single snow stream.
    return blurred + blurred[::-1, :]


# ----------------------------------------------------------------------------
# Public wrapper
# ----------------------------------------------------------------------------
@functools.partial(jax.jit, static_argnums=(1, 2))
def _snow_jit(img, severity, seed):
    mix = _MIX[severity - 1]
    _, height, width = img.shape
    orig_dtype = img.dtype
    io_dtype = orig_dtype if orig_dtype in (jnp.float32, jnp.bfloat16, jnp.float16) \
        else jnp.float32
    blend = float(mix[5])

    snow_tot = _prepare_snow_layers(height, width, mix, seed)

    if width % _LANES == 0:
        # Native-layout path: tile (3, TH, W) directly, pad only H if needed.
        tile_h = _pick_tile_rows(_round_up(height, _SUBLANES), width)
        h_pad = _round_up(height, tile_h)
        x3 = img.astype(io_dtype)
        s2 = snow_tot
        if h_pad != height:
            x3 = jnp.pad(x3, ((0, 0), (0, h_pad - height), (0, 0)))
            s2 = jnp.pad(s2, ((0, h_pad - height), (0, 0)))
        out3 = _run_compose(x3, s2, blend, tile_h, io_dtype)
        out = out3[:, :height, :]
    else:
        # Lane-dense path: flatten spatial dims, pad to (rows, 128).
        n = height * width
        rows = _round_up(pl.cdiv(n, _LANES), _SUBLANES)
        tile_rows = _pick_tile_rows(rows, _LANES)
        rows = _round_up(rows, tile_rows)
        padded = rows * _LANES
        pad = padded - n
        x = img.astype(io_dtype).reshape(3, n)
        s = snow_tot.reshape(n)
        if pad:
            x = jnp.pad(x, ((0, 0), (0, pad)))
            s = jnp.pad(s, (0, pad))
        x3 = x.reshape(3, rows, _LANES)
        s2 = s.reshape(rows, _LANES)
        out3 = _run_compose(x3, s2, blend, tile_rows, io_dtype)
        out = out3.reshape(3, padded)[:, :n].reshape(3, height, width)

    return out.astype(orig_dtype)


def snow(img, severity: int, seed: int = 0):
    """JAX/Pallas equivalent of Snow(severity).forward(img); img is (3, H, W)."""
    if not isinstance(severity, int):
        raise TypeError("Severity must be an integer.")
    if not 0 <= severity <= 5:
        raise ValueError("Severity must be between 0 and 5.")
    if severity == 0:
        return img
    if img.ndim != 3 or img.shape[0] != 3:
        raise ValueError("Snow expects an RGB image of shape (3, H, W).")
    return _snow_jit(img, severity, seed)


def _compose_ref(img, snow_tot, blend):
    """Pure-jnp reference of the fused composite (for correctness check)."""
    x = img.astype(jnp.float32)
    gray = 0.299 * x[0] + 0.587 * x[1] + 0.114 * x[2]
    whitened = jnp.maximum(x, gray[None] * 1.5 + 0.5)
    blended = blend * x + (1.0 - blend) * whitened
    return jnp.clip(blended + snow_tot[None], 0.0, 1.0)


if __name__ == "__main__":
    key = jax.random.PRNGKey(0)
    k1, k2 = jax.random.split(key)
    # Small square image (flattened lane-dense path) and a 128-wide square
    # image (native-layout path, grid of several steps).
    img_small = jax.random.uniform(k1, (3, 16, 16), dtype=jnp.float32)
    img_nat = jax.random.uniform(k2, (3, 128, 128), dtype=jnp.float32)

    for img in (img_small, img_nat):
        h, w = img.shape[1:]
        for severity in (1, 3, 5):
            out = jax.block_until_ready(snow(img, severity, seed=0))
            assert out.shape == img.shape and out.dtype == img.dtype
            assert bool(jnp.all(out >= 0.0)) and bool(jnp.all(out <= 1.0))

            mix = _MIX[severity - 1]
            snow_tot = _prepare_snow_layers(h, w, mix, 0)
            ref = _compose_ref(img, snow_tot, float(mix[5]))
            assert bool(jnp.allclose(out, ref, atol=1e-5, rtol=1e-5)), (
                severity, (h, w), float(jnp.max(jnp.abs(out - ref))))

    # severity 0 is a passthrough
    assert bool(jnp.allclose(snow(img_small, 0, 0), img_small))

    print("KERNEL_OK")
</pallas_src>

<mosaic_0001>
module attributes {stable_mosaic.version = 11 : i64} {
  func.func @_snow_compose_kernel(%arg0: i32, %arg1: memref<3x8x128xf32, #tpu.memory_space<vmem>>, %arg2: memref<8x128xf32, #tpu.memory_space<vmem>>, %arg3: memref<3x8x128xf32, #tpu.memory_space<vmem>>) attributes {dimension_semantics = [#tpu.dimension_semantics<parallel>], iteration_bounds = array<i64: 1>, scalar_prefetch = 0 : i64, scratch_operands = 0 : i64, tpu.core_type = #tpu.core_type<tc>, window_params = [{transform_indices = @transform_0, window_bounds = array<i64: 3, 8, 128>}, {transform_indices = @transform_1, window_bounds = array<i64: 8, 128>}, {transform_indices = @transform_2, window_bounds = array<i64: 3, 8, 128>}]} {
    %c0 = arith.constant 0 : index
    %c0_0 = arith.constant 0 : index
    %c0_1 = arith.constant 0 : index
    %0 = vector.load %arg1[%c0, %c0_0, %c0_1] : memref<3x8x128xf32, #tpu.memory_space<vmem>>, vector<1x8x128xf32>
    %1 = vector.shape_cast %0 : vector<1x8x128xf32> to vector<8x128xf32>
    %c1 = arith.constant 1 : index
    %c0_2 = arith.constant 0 : index
    %c0_3 = arith.constant 0 : index
    %2 = vector.load %arg1[%c1, %c0_2, %c0_3] : memref<3x8x128xf32, #tpu.memory_space<vmem>>, vector<1x8x128xf32>
    %3 = vector.shape_cast %2 : vector<1x8x128xf32> to vector<8x128xf32>
    %c2 = arith.constant 2 : index
    %c0_4 = arith.constant 0 : index
    %c0_5 = arith.constant 0 : index
    %4 = vector.load %arg1[%c2, %c0_4, %c0_5] : memref<3x8x128xf32, #tpu.memory_space<vmem>>, vector<1x8x128xf32>
    %5 = vector.shape_cast %4 : vector<1x8x128xf32> to vector<8x128xf32>
    %cst = arith.constant 2.990000e-01 : f32
    %6 = vector.broadcast %cst : f32 to vector<8x128xf32>
    %7 = arith.mulf %6, %1 : vector<8x128xf32>
    %cst_6 = arith.constant 5.870000e-01 : f32
    %8 = vector.broadcast %cst_6 : f32 to vector<8x128xf32>
    %9 = arith.mulf %8, %3 : vector<8x128xf32>
    %10 = arith.addf %7, %9 : vector<8x128xf32>
    %cst_7 = arith.constant 1.140000e-01 : f32
    %11 = vector.broadcast %cst_7 : f32 to vector<8x128xf32>
    %12 = arith.mulf %11, %5 : vector<8x128xf32>
    %13 = arith.addf %10, %12 : vector<8x128xf32>
    %cst_8 = arith.constant 1.500000e+00 : f32
    %14 = vector.broadcast %cst_8 : f32 to vector<8x128xf32>
    %15 = arith.mulf %13, %14 : vector<8x128xf32>
    %cst_9 = arith.constant 5.000000e-01 : f32
    %16 = vector.broadcast %cst_9 : f32 to vector<8x128xf32>
    %17 = arith.addf %15, %16 : vector<8x128xf32>
    %c0_10 = arith.constant 0 : index
    %c0_11 = arith.constant 0 : index
    %18 = vector.load %arg2[%c0_10, %c0_11] : memref<8x128xf32, #tpu.memory_space<vmem>>, vector<8x128xf32>
    %cst_12 = arith.constant 8.000000e-01 : f32
    %19 = vector.broadcast %cst_12 : f32 to vector<8x128xf32>
    %20 = arith.mulf %19, %1 : vector<8x128xf32>
    %21 = arith.maximumf %1, %17 : vector<8x128xf32>
    %cst_13 = arith.constant 2.000000e-01 : f32
    %22 = vector.broadcast %cst_13 : f32 to vector<8x128xf32>
    %23 = arith.mulf %22, %21 : vector<8x128xf32>
    %24 = arith.addf %20, %23 : vector<8x128xf32>
    %25 = arith.addf %24, %18 : vector<8x128xf32>
    %cst_14 = arith.constant 0.000000e+00 : f32
    %cst_15 = arith.constant 1.000000e+00 : f32
    %26 = vector.broadcast %cst_14 : f32 to vector<8x128xf32>
    %27 = arith.maximumf %26, %25 : vector<8x128xf32>
    %28 = vector.broadcast %cst_15 : f32 to vector<8x128xf32>
    %29 = arith.minimumf %28, %27 : vector<8x128xf32>
    %c0_16 = arith.constant 0 : index
    %c0_17 = arith.constant 0 : index
    %c0_18 = arith.constant 0 : index
    %30 = vector.load %arg3[%c0_16, %c0_17, %c0_18] : memref<3x8x128xf32, #tpu.memory_space<vmem>>, vector<1x8x128xf32>
    %31 = vector.shape_cast %30 : vector<1x8x128xf32> to vector<8x128xf32>
    %32 = vector.shape_cast %29 : vector<8x128xf32> to vector<1x8x128xf32>
    tpu.vector_store %arg3[%c0_16, %c0_17, %c0_18], %32 {strides = array<i32>} : memref<3x8x128xf32, #tpu.memory_space<vmem>>, vector<1x8x128xf32>,
    %cst_19 = arith.constant 8.000000e-01 : f32
    %33 = vector.broadcast %cst_19 : f32 to vector<8x128xf32>
    %34 = arith.mulf %33, %3 : vector<8x128xf32>
    %35 = arith.maximumf %3, %17 : vector<8x128xf32>
    %cst_20 = arith.constant 2.000000e-01 : f32
    %36 = vector.broadcast %cst_20 : f32 to vector<8x128xf32>
    %37 = arith.mulf %36, %35 : vector<8x128xf32>
    %38 = arith.addf %34, %37 : vector<8x128xf32>
    %39 = arith.addf %38, %18 : vector<8x128xf32>
    %cst_21 = arith.constant 0.000000e+00 : f32
    %cst_22 = arith.constant 1.000000e+00 : f32
    %40 = vector.broadcast %cst_21 : f32 to vector<8x128xf32>
    %41 = arith.maximumf %40, %39 : vector<8x128xf32>
    %42 = vector.broadcast %cst_22 : f32 to vector<8x128xf32>
    %43 = arith.minimumf %42, %41 : vector<8x128xf32>
    %c1_23 = arith.constant 1 : index
    %c0_24 = arith.constant 0 : index
    %c0_25 = arith.constant 0 : index
    %44 = vector.load %arg3[%c1_23, %c0_24, %c0_25] : memref<3x8x128xf32, #tpu.memory_space<vmem>>, vector<1x8x128xf32>
    %45 = vector.shape_cast %44 : vector<1x8x128xf32> to vector<8x128xf32>
    %46 = vector.shape_cast %43 : vector<8x128xf32> to vector<1x8x128xf32>
    tpu.vector_store %arg3[%c1_23, %c0_24, %c0_25], %46 {strides = array<i32>} : memref<3x8x128xf32, #tpu.memory_space<vmem>>, vector<1x8x128xf32>,
    %cst_26 = arith.constant 8.000000e-01 : f32
    %47 = vector.broadcast %cst_26 : f32 to vector<8x128xf32>
    %48 = arith.mulf %47, %5 : vector<8x128xf32>
    %49 = arith.maximumf %5, %17 : vector<8x128xf32>
    %cst_27 = arith.constant 2.000000e-01 : f32
    %50 = vector.broadcast %cst_27 : f32 to vector<8x128xf32>
    %51 = arith.mulf %50, %49 : vector<8x128xf32>
    %52 = arith.addf %48, %51 : vector<8x128xf32>
    %53 = arith.addf %52, %18 : vector<8x128xf32>
    %cst_28 = arith.constant 0.000000e+00 : f32
    %cst_29 = arith.constant 1.000000e+00 : f32
    %54 = vector.broadcast %cst_28 : f32 to vector<8x128xf32>
    %55 = arith.maximumf %54, %53 : vector<8x128xf32>
    %56 = vector.broadcast %cst_29 : f32 to vector<8x128xf32>
    %57 = arith.minimumf %56, %55 : vector<8x128xf32>
    %c2_30 = arith.constant 2 : index
    %c0_31 = arith.constant 0 : index
    %c0_32 = arith.constant 0 : index
    %58 = vector.load %arg3[%c2_30, %c0_31, %c0_32] : memref<3x8x128xf32, #tpu.memory_space<vmem>>, vector<1x8x128xf32>
    %59 = vector.shape_cast %58 : vector<1x8x128xf32> to vector<8x128xf32>
    %60 = vector.shape_cast %57 : vector<8x128xf32> to vector<1x8x128xf32>
    tpu.vector_store %arg3[%c2_30, %c0_31, %c0_32], %60 {strides = array<i32>} : memref<3x8x128xf32, #tpu.memory_space<vmem>>, vector<1x8x128xf32>,
    return
  }
  func.func @transform_0(%arg0: i32) -> (i32, i32, i32) {
    %c0_i32 = arith.constant 0 : i32
    %c0_i32_0 = arith.constant 0 : i32
    %c0_i32_1 = arith.constant 0 : i32
    return %c0_i32, %arg0, %c0_i32_0 : i32, i32, i32
  }
  func.func @transform_1(%arg0: i32) -> (i32, i32) {
    %c0_i32 = arith.constant 0 : i32
    %c0_i32_0 = arith.constant 0 : i32
    return %arg0, %c0_i32 : i32, i32
  }
  func.func @transform_2(%arg0: i32) -> (i32, i32, i32) {
    %c0_i32 = arith.constant 0 : i32
    %c0_i32_0 = arith.constant 0 : i32
    %c0_i32_1 = arith.constant 0 : i32
    return %c0_i32, %arg0, %c0_i32_0 : i32, i32, i32
  }
}

</mosaic_0001>

<bundles_post_ra>
// kernel: _snow_jit.1
= control target key start
LH: loop header
LB: loop body
LE: loop exit
PB: predicated region body
PF: predicated region fallthrough
CT: control target
= control target key end

     0   :  { %s94_s0 = inlined_call_operand.vmem [shape: f32[3,8,128], index: 0, kind: input, shape index: {}]   ;;  %s95_s1 = inlined_call_operand.vmem [shape: f32[8,128], index: 1, kind: input, shape index: {}]   ;;  %s96_s2 = inlined_call_operand.vmem [shape: f32[3,8,128], index: 2, kind: output, shape index: {}]  }
   0x1   :  { %v11_v0 = vld [vmem:[%s94_s0] sm:$0xff]  ;;  %v54_v1 = vld [vmem:[%s94_s0 + $0x8] sm:$0xff]  ;;  %v55_v2 = vld [vmem:[%s94_s0 + $0x10] sm:$0xff] }
   0x2   :  { %v16_v3 = vmul.f32 0.299, %v11_v0  ;;  %v17_v4 = vmul.f32 0.587, %v54_v1  ;;  %v19_v5 = vmul.f32 0.114, %v55_v2 }
   0x3   :  { %v24_v10 = vmul.f32 0.8, %v11_v0  ;;  %v32_v11 = vmul.f32 0.8, %v54_v1  ;;  %v41_v14 = vmul.f32 0.8, %v55_v2 }
   0x4   :  { %v18_v6 = vadd.f32 %v17_v4, %v16_v3  ;;  %v23_v19 = vld [vmem:[%s95_s1] sm:$0xff] }
   0x6   :  { %v20_v7 = vadd.f32 %v19_v5, %v18_v6 }
   0x8   :  { %v21_v8 = vmul.f32 1.5, %v20_v7 }
   0xa   :  { %v22_v9 = vadd.f32 0.5, %v21_v8 }
   0xc   :  { %v25_v12 = vmax.f32 %v11_v0, %v22_v9  ;;  %v33_v13 = vmax.f32 %v54_v1, %v22_v9  ;;  %v42_v15 = vmax.f32 %v55_v2, %v22_v9 }
   0xe   :  { %v26_v16 = vmul.f32 0.2, %v25_v12  ;;  %v34_v17 = vmul.f32 0.2, %v33_v13  ;;  %v43_v18 = vmul.f32 0.2, %v42_v15 }
  0x10   :  { %v27_v20 = vadd.f32 %v26_v16, %v24_v10  ;;  %v35_v21 = vadd.f32 %v34_v17, %v32_v11  ;;  %v44_v22 = vadd.f32 %v43_v18, %v41_v14 }
  0x12   :  { %v28_v23 = vadd.f32 %v27_v20, %v23_v19  ;;  %v36_v24 = vadd.f32 %v35_v21, %v23_v19  ;;  %v45_v25 = vadd.f32 %v44_v22, %v23_v19 }
  0x14   :  { %v29_v26 = vmax.f32 %v28_v23, 0.0  ;;  %v37_v27 = vmax.f32 %v36_v24, 0.0  ;;  %v46_v28 = vmax.f32 %v45_v25, 0.0 }
  0x16   :  { %v30_v29 = vmin.f32 %v29_v26, 1.0  ;;  %v38_v30 = vmin.f32 %v37_v27, 1.0  ;;  %v47_v31 = vmin.f32 %v46_v28, 1.0 }
  0x18   :  { %31 = vst [vmem:[%s96_s2] sm:$0xff] %v30_v29  ;;  %56 = vst [vmem:[%s96_s2 + $0x8] sm:$0xff] %v38_v30 }
  0x19   :  { %57 = vst [vmem:[%s96_s2 + $0x10] sm:$0xff] %v47_v31 }

</bundles_post_ra>
